<compile_context>
chip_gen: v6e
topology: v6e:2x2x1
jax: 0.10.0
libtpu: 0.0.40
codegen_flags: <defaults>
</compile_context>

<pallas_src>
import functools

import jax
import jax.numpy as jnp
from jax import lax
from jax.experimental import pallas as pl
from jax.experimental.pallas import tpu as pltpu

_LANE = 128


def _sublane(dtype):
    # minimum sublane multiple for a dtype: 8 (4B), 16 (2B), 32 (1B)
    return max(8, 32 // jnp.dtype(dtype).itemsize)


def _bce_loss_f32(o, t):
    # F.binary_cross_entropy clamps both log terms at -100 (PyTorch behavior).
    log_o = jnp.maximum(jnp.log(o), jnp.float32(-100.0))
    log_1mo = jnp.maximum(jnp.log(1.0 - o), jnp.float32(-100.0))
    return -(t * log_o + (1.0 - t) * log_1mo)


def _mask_ok(t, mask_value):
    # ~torch.isclose(target, mask_value, atol=0.005, rtol=1e-5), logical_not
    # folded into a single `>` compare.
    thresh = 0.005 + 1e-5 * abs(float(mask_value))
    return jnp.abs(t - jnp.float32(mask_value)) > jnp.float32(thresh)


def _num_tensorcores():
    """TensorCores visible to one Pallas device (heuristic, correctness-safe)."""
    try:
        kind = jax.devices()[0].device_kind.lower()
    except Exception:
        return 1
    # v4 / v5p megacore and v7x expose 2 TCs; v2/v3/v5e/v6e are single-TC.
    return 2 if any(tag in kind for tag in ("v7", "v5p", "v4")) else 1


def _masked_bce_kernel(o_ref, t_ref, out_ref, *, tm, per_core_blocks,
                       full_blocks, n_main, mask_value, count_needed):
    c = pl.program_id(0)          # core-split axis (parallel)
    j = pl.program_id(1)          # streaming reduction axis (arbitrary)

    @pl.when(j == 0)
    def _init():
        out_ref[...] = jnp.zeros_like(out_ref)

    # Inputs stream in their own dtype; upcast on the VPU.
    o = o_ref[...].astype(jnp.float32)
    t = t_ref[...].astype(jnp.float32)
    loss = _bce_loss_f32(o, t)
    ok = _mask_ok(t, mask_value) if mask_value is not None else None

    bi = c * per_core_blocks + j          # unclamped global block index

    def _accumulate(valid):
        # select (not multiply) so garbage in ragged/overflow slots can never
        # leak a NaN into the running sums.
        masked = loss if valid is None else jnp.where(valid, loss, jnp.float32(0.0))
        # fold (tm, 128) -> one (8, 128) vreg with pure VPU adds; accumulate
        # into the resident output block (no tile-sized scratch).
        out_ref[0, 0:8, :] += masked.reshape(tm // 8, 8, _LANE).sum(axis=0)
        if count_needed:
            cnt = jnp.where(valid, jnp.float32(1.0), jnp.float32(0.0))
            out_ref[0, 8:16, :] += cnt.reshape(tm // 8, 8, _LANE).sum(axis=0)

    @pl.when(bi < full_blocks)
    def _interior():
        # Steady state: block lies entirely inside the aligned prefix; no
        # index iota work at all (only the mask_value compare, if any).
        _accumulate(ok)

    @pl.when(bi >= full_blocks)
    def _edge():
        # Ragged last block and/or clamped overflow block of an uneven core
        # split: mask by block-local index vs. remaining element count
        # (int32-safe; remaining <= 0 for overflow blocks -> all invalid).
        row = lax.broadcasted_iota(jnp.int32, (tm, _LANE), 0)
        lane = lax.broadcasted_iota(jnp.int32, (tm, _LANE), 1)
        remaining = n_main - bi * (tm * _LANE)
        idx_ok = row * _LANE + lane < remaining
        _accumulate(idx_ok if ok is None else jnp.logical_and(idx_ok, ok))


def masked_bce(output, target, mask_value=None, block_rows=None):
    """Pallas equivalent of inferno MaskedBce(mask_value)(output, target)."""
    assert output.shape == target.shape
    o_flat = output.reshape(-1)
    t_flat = target.reshape(-1)
    n = o_flat.shape[0]
    assert n > 0

    sub = max(_sublane(o_flat.dtype), _sublane(t_flat.dtype))
    max_item = max(jnp.dtype(o_flat.dtype).itemsize,
                   jnp.dtype(t_flat.dtype).itemsize)
    if block_rows is None:
        # ~2 MiB of DMA per input per grid step (HBM-bound streaming sweet spot).
        block_rows = (2 << 20) // (_LANE * max_item)
    block_rows = max(sub, (block_rows // sub) * sub)

    tail = n % _LANE                     # lane-unaligned remainder (< 128)
    n_main = n - tail
    rows = n_main // _LANE
    count_needed = mask_value is not None

    loss_sum = jnp.float32(0.0)
    count = jnp.float32(0.0)

    # ---- streaming kernel over the 128-aligned prefix ----------------------
    if rows >= sub:
        tm = min(block_rows, (rows // sub) * sub)     # multiple of sub, <= rows
        blocks_total = -(-rows // tm)
        ncores = min(_num_tensorcores(), blocks_total)
        per_core_blocks = -(-blocks_total // ncores)
        full_blocks = rows // tm          # blocks entirely inside the prefix
        # int32 flat-index math in the edge path must not overflow.
        assert ncores * per_core_blocks * tm * _LANE < 2 ** 31, "input too large"

        def in_index_map(c, j):
            # Clamp the overflow block of an uneven core split in-bounds; its
            # contribution is zeroed in-kernel (remaining <= 0).
            return (jnp.minimum(c * per_core_blocks + j, blocks_total - 1), 0)

        # No padding copy: only slice off the tiny tail when it exists.
        o2 = (o_flat[:n_main] if tail else o_flat).reshape(rows, _LANE)
        t2 = (t_flat[:n_main] if tail else t_flat).reshape(rows, _LANE)

        planes = 16 if count_needed else 8   # [0:8]=loss vreg, [8:16]=count vreg
        kernel = functools.partial(
            _masked_bce_kernel, tm=tm, per_core_blocks=per_core_blocks,
            full_blocks=full_blocks, n_main=n_main, mask_value=mask_value,
            count_needed=count_needed)

        partials = pl.pallas_call(
            kernel,
            out_shape=jax.ShapeDtypeStruct((ncores, planes, _LANE), jnp.float32),
            grid_spec=pltpu.PrefetchScalarGridSpec(
                num_scalar_prefetch=0,
                grid=(ncores, per_core_blocks),
                in_specs=[pl.BlockSpec((tm, _LANE), in_index_map),
                          pl.BlockSpec((tm, _LANE), in_index_map)],
                out_specs=pl.BlockSpec((1, planes, _LANE),
                                       lambda c, j: (c, 0, 0))),
            compiler_params=pltpu.CompilerParams(
                dimension_semantics=("parallel", "arbitrary")),
        )(o2, t2)

        loss_sum = loss_sum + jnp.sum(partials[:, 0:8, :])
        if count_needed:
            count = count + jnp.sum(partials[:, 8:16, :])
    else:
        # Whole input smaller than one (sub, 128) tile: fold it into the tail.
        tail, n_main = n, 0

    # ---- <128-element (or tiny-input) tail: plain JAX epilogue -------------
    if tail:
        o_t = o_flat[n_main:].astype(jnp.float32)
        t_t = t_flat[n_main:].astype(jnp.float32)
        loss_t = _bce_loss_f32(o_t, t_t)
        if count_needed:
            ok_t = _mask_ok(t_t, mask_value)
            loss_sum = loss_sum + jnp.sum(jnp.where(ok_t, loss_t, 0.0))
            count = count + jnp.sum(ok_t.astype(jnp.float32))
        else:
            loss_sum = loss_sum + jnp.sum(loss_t)

    if not count_needed:
        count = jnp.float32(n)            # exact; no count stream needed
    # count == 0 (everything masked) -> NaN, same as PyTorch's empty mean.
    return loss_sum / count


# ----------------------------- testing ---------------------------------------

def _reference(output, target, mask_value=None):
    o = output.reshape(-1).astype(jnp.float32)
    t = target.reshape(-1).astype(jnp.float32)
    loss = _bce_loss_f32(o, t)
    if mask_value is None:
        return jnp.mean(loss)
    ok = _mask_ok(t, mask_value)
    return jnp.sum(jnp.where(ok, loss, 0.0)) / jnp.sum(ok.astype(jnp.float32))


def _make_inputs(key, shape, mask_value, hit_p=0.2, dtype=jnp.float32):
    k1, k2, k3 = jax.random.split(key, 3)
    output = jax.random.uniform(k1, shape, jnp.float32, 0.01, 0.99)
    target = jax.random.uniform(k2, shape, jnp.float32, 0.0, 1.0)
    if mask_value is not None:
        hit = jax.random.bernoulli(k3, hit_p, shape)
        target = jnp.where(hit, jnp.float32(mask_value), target)
    return output.astype(dtype), target.astype(dtype)


def _check(loss, ref, tol=1e-5):
    assert bool(jnp.isfinite(ref))
    assert jnp.allclose(loss, ref, atol=tol, rtol=tol), (float(loss), float(ref))


if __name__ == "__main__":
    key = jax.random.PRNGKey(0)
    k0, k1, k2 = jax.random.split(key, 3)

    # 1) NCHW float32 with a mask value (interior-only grid, single sweep).
    o, t = _make_inputs(k0, (2, 4, 16, 16), 0.0)
    loss = masked_bce(o, t, mask_value=0.0)
    jax.block_until_ready(loss)
    _check(loss, _reference(o, t, 0.0))

    # 2) Lane-unaligned element count -> ragged edge block in-kernel + tiny
    #    JAX tail epilogue (no padding copy), multi-step accumulation.
    o2, t2 = _make_inputs(k1, (3, 5, 7, 11), 0.25)
    loss2 = masked_bce(o2, t2, mask_value=0.25)
    _check(loss2, _reference(o2, t2, 0.25))

    # 3) bf16 stays bf16 on the HBM wire; mask_value=None path (no count
    #    stream, divisor is n).
    o3, t3 = _make_inputs(k2, (2, 4, 16, 16), None, dtype=jnp.bfloat16)
    loss3 = masked_bce(o3, t3, mask_value=None)
    _check(loss3, _reference(o3, t3, None), tol=1e-4)

    jax.block_until_ready((loss, loss2, loss3))
    print("KERNEL_OK")
</pallas_src>

<mosaic_0001>
module attributes {stable_mosaic.version = 11 : i64} {
  func.func @_masked_bce_kernel(%arg0: i32, %arg1: i32, %arg2: memref<16x128xf32, #tpu.memory_space<vmem>>, %arg3: memref<16x128xf32, #tpu.memory_space<vmem>>, %arg4: memref<1x16x128xf32, #tpu.memory_space<vmem>>) attributes {dimension_semantics = [#tpu.dimension_semantics<parallel>, #tpu.dimension_semantics<arbitrary>], iteration_bounds = array<i64: 1, 1>, scalar_prefetch = 0 : i64, scratch_operands = 0 : i64, tpu.core_type = #tpu.core_type<tc>, window_params = [{transform_indices = @transform_0, window_bounds = array<i64: 16, 128>}, {transform_indices = @transform_1, window_bounds = array<i64: 16, 128>}, {transform_indices = @transform_2, window_bounds = array<i64: 1, 16, 128>}]} {
    %c0_i32 = arith.constant 0 : i32
    %0 = arith.cmpi eq, %arg1, %c0_i32 : i32
    %1 = arith.extui %0 : i1 to i32
    %c0_i32_0 = arith.constant 0 : i32
    %2 = arith.cmpi ne, %1, %c0_i32_0 : i32
    scf.if %2 {
      %cst_14 = arith.constant 0.000000e+00 : f32
      %33 = vector.broadcast %cst_14 : f32 to vector<1x16x128xf32>
      %c0_15 = arith.constant 0 : index
      %c0_16 = arith.constant 0 : index
      %c0_17 = arith.constant 0 : index
      %34 = vector.load %arg4[%c0_15, %c0_16, %c0_17] : memref<1x16x128xf32, #tpu.memory_space<vmem>>, vector<1x16x128xf32>
      tpu.vector_store %arg4[%c0_15, %c0_16, %c0_17], %33 {strides = array<i32>} : memref<1x16x128xf32, #tpu.memory_space<vmem>>, vector<1x16x128xf32>,
    } else {
    }
    %c0 = arith.constant 0 : index
    %c0_1 = arith.constant 0 : index
    %3 = vector.load %arg2[%c0, %c0_1] : memref<16x128xf32, #tpu.memory_space<vmem>>, vector<16x128xf32>
    %c0_2 = arith.constant 0 : index
    %c0_3 = arith.constant 0 : index
    %4 = vector.load %arg3[%c0_2, %c0_3] : memref<16x128xf32, #tpu.memory_space<vmem>>, vector<16x128xf32>
    %5 = math.log %3 : vector<16x128xf32>
    %cst = arith.constant -1.000000e+02 : f32
    %6 = vector.broadcast %cst : f32 to vector<16x128xf32>
    %7 = arith.maximumf %5, %6 : vector<16x128xf32>
    %cst_4 = arith.constant 1.000000e+00 : f32
    %8 = vector.broadcast %cst_4 : f32 to vector<16x128xf32>
    %9 = arith.subf %8, %3 : vector<16x128xf32>
    %10 = math.log %9 : vector<16x128xf32>
    %cst_5 = arith.constant -1.000000e+02 : f32
    %11 = vector.broadcast %cst_5 : f32 to vector<16x128xf32>
    %12 = arith.maximumf %10, %11 : vector<16x128xf32>
    %13 = arith.mulf %4, %7 : vector<16x128xf32>
    %cst_6 = arith.constant 1.000000e+00 : f32
    %14 = vector.broadcast %cst_6 : f32 to vector<16x128xf32>
    %15 = arith.subf %14, %4 : vector<16x128xf32>
    %16 = arith.mulf %15, %12 : vector<16x128xf32>
    %17 = arith.addf %13, %16 : vector<16x128xf32>
    %cst_7 = arith.constant 0.000000e+00 : f32
    %18 = vector.broadcast %cst_7 : f32 to vector<16x128xf32>
    %19 = arith.subf %18, %17 : vector<16x128xf32>
    %cst_8 = arith.constant 0.000000e+00 : f32
    %20 = vector.broadcast %cst_8 : f32 to vector<16x128xf32>
    %21 = arith.subf %4, %20 : vector<16x128xf32>
    %22 = math.absf %21 : vector<16x128xf32>
    %cst_9 = arith.constant 5.000000e-03 : f32
    %23 = vector.broadcast %cst_9 : f32 to vector<16x128xf32>
    %24 = arith.cmpf ogt, %22, %23 : vector<16x128xf32>
    %c1_i32 = arith.constant 1 : i32
    %25 = arith.muli %arg0, %c1_i32 : i32
    %26 = arith.addi %25, %arg1 : i32
    %c1_i32_10 = arith.constant 1 : i32
    %27 = arith.cmpi slt, %26, %c1_i32_10 : i32
    %28 = arith.extui %27 : i1 to i32
    %c0_i32_11 = arith.constant 0 : i32
    %29 = arith.cmpi ne, %28, %c0_i32_11 : i32
    scf.if %29 {
      %cst_14 = arith.constant 0.000000e+00 : f32
      %33 = vector.broadcast %cst_14 : f32 to vector<16x128xf32>
      %34 = arith.select %24, %19, %33 : vector<16x128xi1>, vector<16x128xf32>
      %c0_15 = arith.constant 0 : index
      %c0_16 = arith.constant 0 : index
      %c0_17 = arith.constant 0 : index
      %35 = vector.load %arg4[%c0_15, %c0_16, %c0_17] : memref<1x16x128xf32, #tpu.memory_space<vmem>>, vector<1x8x128xf32>
      %36 = vector.shape_cast %35 : vector<1x8x128xf32> to vector<8x128xf32>
      %37 = vector.shape_cast %34 : vector<16x128xf32> to vector<2x8x128xf32>
      %cst_18 = arith.constant dense<0.000000e+00> : vector<8x128xf32>
      %38 = vector.multi_reduction <add>, %37, %cst_18 [0] : vector<2x8x128xf32> to vector<8x128xf32>
      %39 = arith.addf %36, %38 : vector<8x128xf32>
      %c0_19 = arith.constant 0 : index
      %c0_20 = arith.constant 0 : index
      %c0_21 = arith.constant 0 : index
      %40 = vector.load %arg4[%c0_19, %c0_20, %c0_21] : memref<1x16x128xf32, #tpu.memory_space<vmem>>, vector<1x8x128xf32>
      %41 = vector.shape_cast %40 : vector<1x8x128xf32> to vector<8x128xf32>
      %42 = vector.shape_cast %39 : vector<8x128xf32> to vector<1x8x128xf32>
      tpu.vector_store %arg4[%c0_19, %c0_20, %c0_21], %42 {strides = array<i32>} : memref<1x16x128xf32, #tpu.memory_space<vmem>>, vector<1x8x128xf32>,
      %cst_22 = arith.constant 1.000000e+00 : f32
      %cst_23 = arith.constant 0.000000e+00 : f32
      %43 = vector.broadcast %cst_22 : f32 to vector<16x128xf32>
      %44 = vector.broadcast %cst_23 : f32 to vector<16x128xf32>
      %45 = arith.select %24, %43, %44 : vector<16x128xi1>, vector<16x128xf32>
      %c0_24 = arith.constant 0 : index
      %c8 = arith.constant 8 : index
      %c0_25 = arith.constant 0 : index
      %46 = vector.load %arg4[%c0_24, %c8, %c0_25] : memref<1x16x128xf32, #tpu.memory_space<vmem>>, vector<1x8x128xf32>
      %47 = vector.shape_cast %46 : vector<1x8x128xf32> to vector<8x128xf32>
      %48 = vector.shape_cast %45 : vector<16x128xf32> to vector<2x8x128xf32>
      %cst_26 = arith.constant dense<0.000000e+00> : vector<8x128xf32>
      %49 = vector.multi_reduction <add>, %48, %cst_26 [0] : vector<2x8x128xf32> to vector<8x128xf32>
      %50 = arith.addf %47, %49 : vector<8x128xf32>
      %c0_27 = arith.constant 0 : index
      %c8_28 = arith.constant 8 : index
      %c0_29 = arith.constant 0 : index
      %51 = vector.load %arg4[%c0_27, %c8_28, %c0_29] : memref<1x16x128xf32, #tpu.memory_space<vmem>>, vector<1x8x128xf32>
      %52 = vector.shape_cast %51 : vector<1x8x128xf32> to vector<8x128xf32>
      %53 = vector.shape_cast %50 : vector<8x128xf32> to vector<1x8x128xf32>
      tpu.vector_store %arg4[%c0_27, %c8_28, %c0_29], %53 {strides = array<i32>} : memref<1x16x128xf32, #tpu.memory_space<vmem>>, vector<1x8x128xf32>,
    } else {
    }
    %c1_i32_12 = arith.constant 1 : i32
    %30 = arith.cmpi sge, %26, %c1_i32_12 : i32
    %31 = arith.extui %30 : i1 to i32
    %c0_i32_13 = arith.constant 0 : i32
    %32 = arith.cmpi ne, %31, %c0_i32_13 : i32
    scf.if %32 {
      %33 = tpu.iota {dimensions = array<i32: 0>} : vector<16x128xi32>
      %34 = tpu.iota {dimensions = array<i32: 1>} : vector<16x128xi32>
      %c2048_i32 = arith.constant 2048 : i32
      %35 = arith.muli %26, %c2048_i32 : i32
      %c2048_i32_14 = arith.constant 2048 : i32
      %36 = arith.subi %c2048_i32_14, %35 : i32
      %c128_i32 = arith.constant 128 : i32
      %37 = vector.broadcast %c128_i32 : i32 to vector<16x128xi32>
      %38 = arith.muli %33, %37 : vector<16x128xi32>
      %39 = arith.addi %38, %34 : vector<16x128xi32>
      %40 = vector.broadcast %36 : i32 to vector<16x128xi32>
      %41 = arith.cmpi slt, %39, %40 : vector<16x128xi32>
      %42 = arith.andi %41, %24 : vector<16x128xi1>
      %cst_15 = arith.constant 0.000000e+00 : f32
      %43 = vector.broadcast %cst_15 : f32 to vector<16x128xf32>
      %44 = arith.select %42, %19, %43 : vector<16x128xi1>, vector<16x128xf32>
      %c0_16 = arith.constant 0 : index
      %c0_17 = arith.constant 0 : index
      %c0_18 = arith.constant 0 : index
      %45 = vector.load %arg4[%c0_16, %c0_17, %c0_18] : memref<1x16x128xf32, #tpu.memory_space<vmem>>, vector<1x8x128xf32>
      %46 = vector.shape_cast %45 : vector<1x8x128xf32> to vector<8x128xf32>
      %47 = vector.shape_cast %44 : vector<16x128xf32> to vector<2x8x128xf32>
      %cst_19 = arith.constant dense<0.000000e+00> : vector<8x128xf32>
      %48 = vector.multi_reduction <add>, %47, %cst_19 [0] : vector<2x8x128xf32> to vector<8x128xf32>
      %49 = arith.addf %46, %48 : vector<8x128xf32>
      %c0_20 = arith.constant 0 : index
      %c0_21 = arith.constant 0 : index
      %c0_22 = arith.constant 0 : index
      %50 = vector.load %arg4[%c0_20, %c0_21, %c0_22] : memref<1x16x128xf32, #tpu.memory_space<vmem>>, vector<1x8x128xf32>
      %51 = vector.shape_cast %50 : vector<1x8x128xf32> to vector<8x128xf32>
      %52 = vector.shape_cast %49 : vector<8x128xf32> to vector<1x8x128xf32>
      tpu.vector_store %arg4[%c0_20, %c0_21, %c0_22], %52 {strides = array<i32>} : memref<1x16x128xf32, #tpu.memory_space<vmem>>, vector<1x8x128xf32>,
      %cst_23 = arith.constant 1.000000e+00 : f32
      %cst_24 = arith.constant 0.000000e+00 : f32
      %53 = vector.broadcast %cst_23 : f32 to vector<16x128xf32>
      %54 = vector.broadcast %cst_24 : f32 to vector<16x128xf32>
      %55 = arith.select %42, %53, %54 : vector<16x128xi1>, vector<16x128xf32>
      %c0_25 = arith.constant 0 : index
      %c8 = arith.constant 8 : index
      %c0_26 = arith.constant 0 : index
      %56 = vector.load %arg4[%c0_25, %c8, %c0_26] : memref<1x16x128xf32, #tpu.memory_space<vmem>>, vector<1x8x128xf32>
      %57 = vector.shape_cast %56 : vector<1x8x128xf32> to vector<8x128xf32>
      %58 = vector.shape_cast %55 : vector<16x128xf32> to vector<2x8x128xf32>
      %cst_27 = arith.constant dense<0.000000e+00> : vector<8x128xf32>
      %59 = vector.multi_reduction <add>, %58, %cst_27 [0] : vector<2x8x128xf32> to vector<8x128xf32>
      %60 = arith.addf %57, %59 : vector<8x128xf32>
      %c0_28 = arith.constant 0 : index
      %c8_29 = arith.constant 8 : index
      %c0_30 = arith.constant 0 : index
      %61 = vector.load %arg4[%c0_28, %c8_29, %c0_30] : memref<1x16x128xf32, #tpu.memory_space<vmem>>, vector<1x8x128xf32>
      %62 = vector.shape_cast %61 : vector<1x8x128xf32> to vector<8x128xf32>
      %63 = vector.shape_cast %60 : vector<8x128xf32> to vector<1x8x128xf32>
      tpu.vector_store %arg4[%c0_28, %c8_29, %c0_30], %63 {strides = array<i32>} : memref<1x16x128xf32, #tpu.memory_space<vmem>>, vector<1x8x128xf32>,
    } else {
    }
    return
  }
  func.func @transform_0(%arg0: i32, %arg1: i32) -> (i32, i32) {
    %c1_i32 = arith.constant 1 : i32
    %0 = arith.muli %arg0, %c1_i32 : i32
    %1 = arith.addi %0, %arg1 : i32
    %c0_i32 = arith.constant 0 : i32
    %2 = arith.minsi %1, %c0_i32 : i32
    %c0_i32_0 = arith.constant 0 : i32
    %c0_i32_1 = arith.constant 0 : i32
    return %2, %c0_i32_0 : i32, i32
  }
  func.func @transform_1(%arg0: i32, %arg1: i32) -> (i32, i32) {
    %c1_i32 = arith.constant 1 : i32
    %0 = arith.muli %arg0, %c1_i32 : i32
    %1 = arith.addi %0, %arg1 : i32
    %c0_i32 = arith.constant 0 : i32
    %2 = arith.minsi %1, %c0_i32 : i32
    %c0_i32_0 = arith.constant 0 : i32
    %c0_i32_1 = arith.constant 0 : i32
    return %2, %c0_i32_0 : i32, i32
  }
  func.func @transform_2(%arg0: i32, %arg1: i32) -> (i32, i32, i32) {
    %c0_i32 = arith.constant 0 : i32
    %c0_i32_0 = arith.constant 0 : i32
    %c0_i32_1 = arith.constant 0 : i32
    return %arg0, %c0_i32, %c0_i32_0 : i32, i32, i32
  }
}

</mosaic_0001>

<bundles_post_ra>
// kernel: tpu_custom_call.1
= control target key start
LH: loop header
LB: loop body
LE: loop exit
PB: predicated region body
PF: predicated region fallthrough
CT: control target
= control target key end

     0   :  { %7 = vsyncpa [#allocation3], 0  ;;  %s304_s0 = inlined_call_operand.hbm [shape: f32[16,128], index: 0, kind: input, shape index: {}]   ;;  %s305_s1 = inlined_call_operand.hbm [shape: f32[16,128], index: 1, kind: input, shape index: {}]   ;;  %s306_s2 = inlined_call_operand.hbm [shape: f32[1,16,128], index: 2, kind: output, shape index: {}]  }
   0x1   :  { %8 = vsyncpa [#allocation6], 0 }
   0x2   :  { %9 = vsyncpa [#allocation4], 0  ;;  %s249_s9 = smov [#allocation2]  }
   0x3   :  { %s21_s10 = sshll.u32 %s249_s9, 4  ;;  %s22_s10 = int_to_ptr.vmem [resolvable:$true] %s21_s10 }
   0x4   :  { %s191_s11 = scalar_lea.vmem %s22_s10, 256  ;;  %p196_p1 = scmp.lt.s32.totalorder %s22_s10, %s22_s10 }
   0x5   :  { %p192_p0 = scmp.ne.s32.totalorder %s22_s10, %s191_s11  ;;  %p197_p2 = scmp.lt.s32.totalorder %s191_s11, %s191_s11 }
   0x7   :  { %p198_p3 = por %p197_p2, %p196_p1 }
   0x9   :  { %p199_p4 = pnand %p198_p3, %p192_p0 }
   0xb   :  { %202 = shalt.err (!%p199_p4)
}
   0xc   :  { %s250_s12 = smov 128   ;;  %s251_s13 = smov 8  }
   0xd   :  { %27 = dma.hbm_to_vmem [thread:$0]  %s304_s0, 256, %s22_s10, [#allocation3], %s250_s12, %s250_s12, %s251_s13  }
   0xe   :  { %s252_s16 = smov [#allocation5]  }
   0xf   :  { %s39_s17 = sshll.u32 %s252_s16, 4  ;;  %s40_s17 = int_to_ptr.vmem [resolvable:$true] %s39_s17 }
  0x10   :  { %s211_s18 = scalar_lea.vmem %s40_s17, 256  ;;  %p216_p6 = scmp.lt.s32.totalorder %s40_s17, %s40_s17 }
  0x11   :  { %p212_p5 = scmp.ne.s32.totalorder %s40_s17, %s211_s18  ;;  %p217_p7 = scmp.lt.s32.totalorder %s211_s18, %s211_s18 }
  0x13   :  { %p218_p8 = por %p217_p7, %p216_p6 }
  0x15   :  { %p219_p9 = pnand %p218_p8, %p212_p5 }
  0x17   :  { %222 = shalt.err (!%p219_p9)
}
  0x18   :  { %45 = dma.hbm_to_vmem [thread:$0]  %s305_s1, 256, %s40_s17, [#allocation6], %s250_s12, %s250_s12, %s251_s13  }
  0x19   :  { %243 = dma.done.wait [#allocation3], 256  }
  0x1a   :  { %244 = vsyncadd [#allocation3], 4294967040 }
  0x1b   :  { %245 = dma.done.wait [#allocation6], 256  }
  0x1c   :  { %246 = vsyncadd [#allocation6], 4294967040  ;;  %v66_v0 = vld [vmem:[#allocation2] sm:$0xff]  ;;  %v67_v1 = vld [vmem:[#allocation2 + $0x8] sm:$0xff]  ;;  %v253_v10 = vmov 0.0   ;;  %s254_s0 = smov [#allocation7]  }
  0x1d   :  { %v68_v2 = vld [vmem:[#allocation5] sm:$0xff]  ;;  %v69_v3 = vld [vmem:[#allocation5 + $0x8] sm:$0xff]  ;;  %175 = vlog2.f32 %v66_v0  ;;  %v76_v4 = vsub.f32 1.0, %v66_v0  ;;  %v77_v5 = vsub.f32 1.0, %v67_v1  ;;  %s152_s1 = sshll.u32 %s254_s0, 4  ;;  %s153_s1 = int_to_ptr.vmem [resolvable:$true] %s152_s1 }
  0x1e   :  { %177 = vlog2.f32 %v67_v1  ;;  %v94_v6 = vand.u32 2147483647, %v68_v2  ;;  %v95_v7 = vand.u32 2147483647, %v69_v3  ;;  %v86_v22 = vsub.f32 1.0, %v68_v2  ;;  %s223_s21 = scalar_lea.vmem %s153_s1, 256  ;;  %p228_p11 = scmp.lt.s32.totalorder %s153_s1, %s153_s1 }
  0x1f   :  { %179 = vlog2.f32 %v76_v4  ;;  %v87_v25 = vsub.f32 1.0, %v69_v3  ;;  %p224_p10 = scmp.ne.s32.totalorder %s153_s1, %s223_s21  ;;  %p229_p12 = scmp.lt.s32.totalorder %s223_s21, %s223_s21 }
  0x20   :  { %181 = vlog2.f32 %v77_v5  ;;  %vm282_vm0 = vcmp.gt.f32.partialorder %v94_v6, 0.005  ;;  %vm286_vm1 = vcmp.gt.f32.partialorder %v95_v7, 0.005 }
  0x21   :  { %v109_v11 = vsel %vm282_vm0, 1.0, %v253_v10  ;;  %v110_v12 = vsel %vm286_vm1, 1.0, %v253_v10  ;;  %p230_p13 = por %p229_p12, %p228_p11 }
  0x22   :  { %v112_v13 = vadd.f32 %v110_v12, %v109_v11 }
  0x23   :  { %p231_p0 = pnand %p230_p13, %p224_p10 }
  0x24   :  { %114 = vst [vmem:[#allocation7 + $0x8] sm:$0xff] %v112_v13 }
  0x2a   :  { %v176_v14 = vpop.eup %175 }
  0x2b   :  { %v178_v15 = vpop.eup %177  ;;  %v71_v16 = vmul.f32 0.6931472, %v176_v14 }
  0x2c   :  { %v180_v17 = vpop.eup %179  ;;  %v73_v18 = vmul.f32 0.6931472, %v178_v15 }
  0x2d   :  { %v182_v19 = vpop.eup %181  ;;  %v74_v20 = vmax.f32 %v71_v16, -100.0  ;;  %v79_v21 = vmul.f32 0.6931472, %v180_v17 }
  0x2e   :  { %v75_v23 = vmax.f32 %v73_v18, -100.0  ;;  %v81_v24 = vmul.f32 0.6931472, %v182_v19 }
  0x2f   :  { %v82_v26 = vmax.f32 %v79_v21, -100.0  ;;  %v84_v27 = vmul.f32 %v74_v20, %v68_v2 }
  0x30   :  { %v83_v28 = vmax.f32 %v81_v24, -100.0  ;;  %v85_v29 = vmul.f32 %v75_v23, %v69_v3 }
  0x31   :  { %v88_v30 = vmul.f32 %v86_v22, %v82_v26 }
  0x32   :  { %v89_v31 = vmul.f32 %v87_v25, %v83_v28 }
  0x33   :  { %v90_v32 = vadd.f32 %v88_v30, %v84_v27 }
  0x34   :  { %v91_v33 = vadd.f32 %v89_v31, %v85_v29 }
  0x35   :  { %v92_v34 = vsub.f32 0.0, %v90_v32 }
  0x36   :  { %v93_v35 = vsub.f32 0.0, %v91_v33 }
  0x37   :  { %v103_v36 = vsel %vm282_vm0, %v92_v34, 0.0 }
  0x38   :  { %v104_v37 = vsel %vm286_vm1, %v93_v35, 0.0 }
  0x39   :  { %v106_v38 = vadd.f32 %v104_v37, %v103_v36 }
  0x3b   :  { %108 = vst [vmem:[#allocation7] sm:$0xff] %v106_v38 }
  0x3c   :  { %234 = shalt.err (!%p231_p0)
}
  0x3d   :  { %158 = dma.vmem_to_hbm [thread:$0]  %s153_s1, 256, %s306_s2, [#allocation4], %s250_s12, %s250_s12, %s251_s13  }
  0x3e   :  { %247 = dma.done.wait [#allocation4], 256  }
  0x3f   :  { %248 = vsyncadd [#allocation4], 4294967040 }
  0x40   :  { %162 = vsyncpa [#allocation3], 1 }
  0x41   :  { %163 = vsyncpa [#allocation6], 1 }
  0x42   :  { %164 = vsyncpa [#allocation4], 1 }

</bundles_post_ra>
